<compile_context>
chip_gen: v7x
topology: tpu7x:2x2x1
jax: 0.10.0
libtpu: 0.0.40
codegen_flags: <defaults>
</compile_context>

<pallas_src>
import functools

import jax
import jax.numpy as jnp
from jax.experimental import pallas as pl
from jax.experimental.pallas import tpu as pltpu


def _ca_kernel(x_ref, w1t_ref, b1_ref, w2t_ref, b2_ref, o_ref, *, inv_hw):
    """Fused CALayer for one (TB, C, HWp) batch tile.

    x_ref  : (TB, C, HWp) feature map, native dtype (channels on sublanes,
             pixels on lanes; HWp lane-padded to a multiple of 128 with zeros)
    w1t_ref: (C, Cr)  squeeze weight, pre-transposed, f32
    b1_ref : (1, Cr)  f32
    w2t_ref: (Cr, C)  excite weight, pre-transposed, f32
    b2_ref : (1, C)   f32
    o_ref  : (TB, C, HWp) native dtype
    """
    # Global average pool: accumulate in f32, divide by the TRUE H*W
    # (lane padding is zeros so it does not perturb the sum).
    pooled = jnp.sum(x_ref[...], axis=-1, dtype=jnp.float32) * inv_hw       # (TB, C)
    # Squeeze 1x1 conv (+ReLU), excite 1x1 conv (+Sigmoid), batched over TB.
    h = jnp.dot(pooled, w1t_ref[...], preferred_element_type=jnp.float32)
    h = jnp.maximum(h + b1_ref[...], 0.0)                                    # (TB, Cr)
    s = jnp.dot(h, w2t_ref[...], preferred_element_type=jnp.float32)
    s = jax.nn.sigmoid(s + b2_ref[...])                                      # (TB, C)
    # Re-read the ref here (don't keep the multi-MiB tile live across the
    # matmuls) and store in the streaming dtype.
    o_ref[...] = x_ref[...] * s[:, :, None].astype(o_ref.dtype)


def calayer_forward(x, w1, b1, w2, b2):
    """CALayer forward.

    x : (B, C, H, W)   NCHW feature map (any float dtype; output matches)
    w1: (Cr, C, 1, 1)  torch Conv2d(C, C//reduction, 1) weight
    b1: (Cr,)
    w2: (C, Cr, 1, 1)  torch Conv2d(C//reduction, C, 1) weight
    b2: (C,)
    returns (B, C, H, W) in x.dtype
    """
    B, C, H, W = x.shape
    Cr = w1.shape[0]
    HW = H * W
    HWp = ((HW + 127) // 128) * 128            # lane-dense stores
    itemsize = jnp.dtype(x.dtype).itemsize

    x2 = x.reshape(B, C, HW)
    if HWp != HW:
        x2 = jnp.pad(x2, ((0, 0), (0, 0), (0, HWp - HW)))

    w1t = w1.reshape(Cr, C).astype(jnp.float32).T          # (C, Cr)
    w2t = w2.reshape(C, Cr).astype(jnp.float32).T          # (Cr, C)
    b1r = b1.reshape(1, Cr).astype(jnp.float32)
    b2r = b2.reshape(1, C).astype(jnp.float32)

    # --- generation-aware VMEM budget -------------------------------------
    try:
        vmem_cap = int(pltpu.get_tpu_info().vmem_capacity_bytes)
    except Exception:
        vmem_cap = 64 * 1024 * 1024            # conservative (v7x per-TC)
    budget = vmem_cap // 2                     # headroom for weights / compiler scratch

    per_elem = C * HWp * itemsize              # one batch element, one copy
    # in + out blocks, each double-buffered by the pipeline -> 4 copies live.
    assert 4 * per_elem <= budget, (
        "per-batch feature map too large for single-pass VMEM residency"
    )  # TODO(synk): two-pass spatially-tiled fallback for very large H*W.

    tb = max(1, min(B, budget // (4 * per_elem)))
    if B >= 2:
        tb = min(tb, (B + 1) // 2)             # keep >= 2 grid steps (v7x megacore)
    while B % tb != 0:                         # avoid partial edge blocks
        tb -= 1
    grid_b = B // tb

    weight_bytes = (2 * C * Cr + C + Cr) * 4
    need = 4 * tb * per_elem + weight_bytes + (2 << 20)
    vmem_limit = int(min(vmem_cap * 9 // 10, max(need, 32 << 20)))

    cost = pl.CostEstimate(
        flops=2 * B * C * HW + 4 * B * C * Cr,
        transcendentals=B * C,
        bytes_accessed=2 * B * C * HW * itemsize + weight_bytes,
    )

    kernel = functools.partial(_ca_kernel, inv_hw=1.0 / HW)

    out = pl.pallas_call(
        kernel,
        out_shape=jax.ShapeDtypeStruct((B, C, HWp), x.dtype),
        grid=(grid_b,),
        in_specs=[
            pl.BlockSpec((tb, C, HWp), lambda b: (b, 0, 0)),
            pl.BlockSpec((C, Cr), lambda b: (0, 0)),
            pl.BlockSpec((1, Cr), lambda b: (0, 0)),
            pl.BlockSpec((Cr, C), lambda b: (0, 0)),
            pl.BlockSpec((1, C), lambda b: (0, 0)),
        ],
        out_specs=pl.BlockSpec((tb, C, HWp), lambda b: (b, 0, 0)),
        compiler_params=pltpu.CompilerParams(
            dimension_semantics=("parallel",),
            vmem_limit_bytes=vmem_limit,
        ),
        cost_estimate=cost,
    )(x2, w1t, b1r, w2t, b2r)

    if HWp != HW:
        out = out[:, :, :HW]
    return out.reshape(B, C, H, W)


def _calayer_reference(x, w1, b1, w2, b2):
    """Pure-JAX reference (mirrors the PyTorch module), computed in f32."""
    B, C, H, W = x.shape
    Cr = w1.shape[0]
    xf = x.astype(jnp.float32)
    w1m = w1.reshape(Cr, C).astype(jnp.float32)
    w2m = w2.reshape(C, Cr).astype(jnp.float32)
    y = jnp.mean(xf, axis=(2, 3), keepdims=True)                       # (B,C,1,1)
    h = jnp.einsum("rc,bcij->brij", w1m, y) + b1.reshape(1, Cr, 1, 1)
    h = jnp.maximum(h, 0.0)
    s = jnp.einsum("cr,brij->bcij", w2m, h) + b2.reshape(1, C, 1, 1)
    s = jax.nn.sigmoid(s)
    return xf * s


if __name__ == "__main__":
    fwd = jax.jit(calayer_forward)

    # ---- Case 1: f32, H*W already a multiple of 128 -----------------------
    B, C, H, W = 2, 64, 16, 16
    reduction = 16
    Cr = C // reduction
    key = jax.random.PRNGKey(0)
    k1, k2, k3, k4, k5 = jax.random.split(key, 5)
    x = jax.random.uniform(k1, (B, C, H, W), dtype=jnp.float32)
    w1 = jax.random.normal(k2, (Cr, C, 1, 1), dtype=jnp.float32) * (1.0 / (C ** 0.5))
    b1 = jax.random.normal(k3, (Cr,), dtype=jnp.float32) * 0.01
    w2 = jax.random.normal(k4, (C, Cr, 1, 1), dtype=jnp.float32) * (1.0 / (Cr ** 0.5))
    b2 = jax.random.normal(k5, (C,), dtype=jnp.float32) * 0.01

    out = jax.block_until_ready(fwd(x, w1, b1, w2, b2))
    ref = _calayer_reference(x, w1, b1, w2, b2)
    assert out.shape == (B, C, H, W) and out.dtype == x.dtype
    assert bool(jnp.all(jnp.isfinite(out)))
    err = float(jnp.max(jnp.abs(out - ref)))
    assert err < 1e-4, f"f32 mismatch vs reference: {err}"

    # ---- Case 2: bf16 streaming path + non-128-multiple H*W (lane padding) -
    B2, C2, H2, W2, red2 = 1, 32, 10, 10, 8
    Cr2 = C2 // red2
    j1, j2, j3, j4, j5 = jax.random.split(jax.random.PRNGKey(1), 5)
    x2 = jax.random.uniform(j1, (B2, C2, H2, W2), dtype=jnp.float32).astype(jnp.bfloat16)
    w1b = jax.random.normal(j2, (Cr2, C2, 1, 1), dtype=jnp.float32) * (1.0 / (C2 ** 0.5))
    b1b = jax.random.normal(j3, (Cr2,), dtype=jnp.float32) * 0.01
    w2b = jax.random.normal(j4, (C2, Cr2, 1, 1), dtype=jnp.float32) * (1.0 / (Cr2 ** 0.5))
    b2b = jax.random.normal(j5, (C2,), dtype=jnp.float32) * 0.01

    out2 = jax.block_until_ready(fwd(x2, w1b, b1b, w2b, b2b))
    ref2 = _calayer_reference(x2, w1b, b1b, w2b, b2b)
    assert out2.shape == (B2, C2, H2, W2) and out2.dtype == jnp.bfloat16
    assert bool(jnp.all(jnp.isfinite(out2.astype(jnp.float32))))
    err2 = float(jnp.max(jnp.abs(out2.astype(jnp.float32) - ref2)))
    assert err2 < 5e-2, f"bf16 mismatch vs reference: {err2}"

    print("KERNEL_OK")
</pallas_src>

<mosaic_0001>
module attributes {stable_mosaic.version = 11 : i64} {
  func.func @_ca_kernel(%arg0: i32, %arg1: memref<1x64x256xf32, #tpu.memory_space<vmem>>, %arg2: memref<64x4xf32, #tpu.memory_space<vmem>>, %arg3: memref<1x4xf32, #tpu.memory_space<vmem>>, %arg4: memref<4x64xf32, #tpu.memory_space<vmem>>, %arg5: memref<1x64xf32, #tpu.memory_space<vmem>>, %arg6: memref<1x64x256xf32, #tpu.memory_space<vmem>>) attributes {dimension_semantics = [#tpu.dimension_semantics<parallel>], iteration_bounds = array<i64: 2>, scalar_prefetch = 0 : i64, scratch_operands = 0 : i64, tpu.core_type = #tpu.core_type<tc>, window_params = [{transform_indices = @transform_0, window_bounds = array<i64: 1, 64, 256>}, {pipeline_mode = #tpu.pipeline_mode<synchronous>, transform_indices = @transform_1, window_bounds = array<i64: 64, 4>}, {pipeline_mode = #tpu.pipeline_mode<synchronous>, transform_indices = @transform_2, window_bounds = array<i64: 1, 4>}, {pipeline_mode = #tpu.pipeline_mode<synchronous>, transform_indices = @transform_3, window_bounds = array<i64: 4, 64>}, {pipeline_mode = #tpu.pipeline_mode<synchronous>, transform_indices = @transform_4, window_bounds = array<i64: 1, 64>}, {transform_indices = @transform_5, window_bounds = array<i64: 1, 64, 256>}]} {
    %c0 = arith.constant 0 : index
    %c0_0 = arith.constant 0 : index
    %c0_1 = arith.constant 0 : index
    %0 = vector.load %arg1[%c0, %c0_0, %c0_1] : memref<1x64x256xf32, #tpu.memory_space<vmem>>, vector<1x64x256xf32>
    %cst = arith.constant dense<0.000000e+00> : vector<1x64xf32>
    %1 = vector.multi_reduction <add>, %0, %cst [2] : vector<1x64x256xf32> to vector<1x64xf32>
    %cst_2 = arith.constant 3.906250e-03 : f32
    %2 = vector.broadcast %cst_2 : f32 to vector<1x64xf32>
    %3 = arith.mulf %1, %2 : vector<1x64xf32>
    %c0_3 = arith.constant 0 : index
    %c0_4 = arith.constant 0 : index
    %4 = vector.load %arg2[%c0_3, %c0_4] : memref<64x4xf32, #tpu.memory_space<vmem>>, vector<64x4xf32>
    %cst_5 = arith.constant dense<0.000000e+00> : vector<1x4xf32>
    %5 = tpu.matmul %3, %4, %cst_5 {dimension_numbers = #tpu.dot_dimension_numbers<[1], [0], [0], [1], [0, 0, 1, 1], [], []>} : vector<1x64xf32>, vector<64x4xf32>, vector<1x4xf32> -> vector<1x4xf32>
    %c0_6 = arith.constant 0 : index
    %c0_7 = arith.constant 0 : index
    %6 = vector.load %arg3[%c0_6, %c0_7] : memref<1x4xf32, #tpu.memory_space<vmem>>, vector<1x4xf32>
    %7 = arith.addf %5, %6 : vector<1x4xf32>
    %cst_8 = arith.constant 0.000000e+00 : f32
    %8 = vector.broadcast %cst_8 : f32 to vector<1x4xf32>
    %9 = arith.maximumf %7, %8 : vector<1x4xf32>
    %c0_9 = arith.constant 0 : index
    %c0_10 = arith.constant 0 : index
    %10 = vector.load %arg4[%c0_9, %c0_10] : memref<4x64xf32, #tpu.memory_space<vmem>>, vector<4x64xf32>
    %cst_11 = arith.constant dense<0.000000e+00> : vector<1x64xf32>
    %11 = tpu.matmul %9, %10, %cst_11 {dimension_numbers = #tpu.dot_dimension_numbers<[1], [0], [0], [1], [0, 0, 1, 1], [], []>} : vector<1x4xf32>, vector<4x64xf32>, vector<1x64xf32> -> vector<1x64xf32>
    %c0_12 = arith.constant 0 : index
    %c0_13 = arith.constant 0 : index
    %12 = vector.load %arg5[%c0_12, %c0_13] : memref<1x64xf32, #tpu.memory_space<vmem>>, vector<1x64xf32>
    %13 = arith.addf %11, %12 : vector<1x64xf32>
    %14 = arith.negf %13 : vector<1x64xf32>
    %15 = math.exp %14 : vector<1x64xf32>
    %cst_14 = arith.constant 1.000000e+00 : f32
    %16 = vector.broadcast %cst_14 : f32 to vector<1x64xf32>
    %17 = arith.addf %16, %15 : vector<1x64xf32>
    %18 = arith.divf %16, %17 : vector<1x64xf32>
    %c0_15 = arith.constant 0 : index
    %c0_16 = arith.constant 0 : index
    %c0_17 = arith.constant 0 : index
    %19 = vector.load %arg1[%c0_15, %c0_16, %c0_17] : memref<1x64x256xf32, #tpu.memory_space<vmem>>, vector<1x64x256xf32>
    %20 = vector.shape_cast %18 : vector<1x64xf32> to vector<1x64x1xf32>
    %21 = vector.broadcast %20 : vector<1x64x1xf32> to vector<1x64x256xf32>
    %22 = arith.mulf %19, %21 : vector<1x64x256xf32>
    %c0_18 = arith.constant 0 : index
    %c0_19 = arith.constant 0 : index
    %c0_20 = arith.constant 0 : index
    %23 = vector.load %arg6[%c0_18, %c0_19, %c0_20] : memref<1x64x256xf32, #tpu.memory_space<vmem>>, vector<1x64x256xf32>
    tpu.vector_store %arg6[%c0_18, %c0_19, %c0_20], %22 {strides = array<i32>} : memref<1x64x256xf32, #tpu.memory_space<vmem>>, vector<1x64x256xf32>,
    return
  }
  func.func @transform_0(%arg0: i32) -> (i32, i32, i32) {
    %c0_i32 = arith.constant 0 : i32
    %c0_i32_0 = arith.constant 0 : i32
    %c0_i32_1 = arith.constant 0 : i32
    return %arg0, %c0_i32, %c0_i32_0 : i32, i32, i32
  }
  func.func @transform_1(%arg0: i32) -> (i32, i32) {
    %c0_i32 = arith.constant 0 : i32
    %c0_i32_0 = arith.constant 0 : i32
    %c0_i32_1 = arith.constant 0 : i32
    return %c0_i32, %c0_i32_0 : i32, i32
  }
  func.func @transform_2(%arg0: i32) -> (i32, i32) {
    %c0_i32 = arith.constant 0 : i32
    %c0_i32_0 = arith.constant 0 : i32
    %c0_i32_1 = arith.constant 0 : i32
    return %c0_i32, %c0_i32_0 : i32, i32
  }
  func.func @transform_3(%arg0: i32) -> (i32, i32) {
    %c0_i32 = arith.constant 0 : i32
    %c0_i32_0 = arith.constant 0 : i32
    %c0_i32_1 = arith.constant 0 : i32
    return %c0_i32, %c0_i32_0 : i32, i32
  }
  func.func @transform_4(%arg0: i32) -> (i32, i32) {
    %c0_i32 = arith.constant 0 : i32
    %c0_i32_0 = arith.constant 0 : i32
    %c0_i32_1 = arith.constant 0 : i32
    return %c0_i32, %c0_i32_0 : i32, i32
  }
  func.func @transform_5(%arg0: i32) -> (i32, i32, i32) {
    %c0_i32 = arith.constant 0 : i32
    %c0_i32_0 = arith.constant 0 : i32
    %c0_i32_1 = arith.constant 0 : i32
    return %arg0, %c0_i32, %c0_i32_0 : i32, i32, i32
  }
}

</mosaic_0001>

<bundles_post_ra>
// kernel: calayer_forward.1
= control target key start
LH: loop header
LB: loop body
LE: loop exit
PB: predicated region body
PF: predicated region fallthrough
CT: control target
= control target key end

     0   :  { %s747_s18 = smov 0   ;;  %s898_s0 = inlined_call_operand.vmem [shape: f32[2,64,256], index: 0, kind: input, shape index: {}]   ;;  %s899_s1 = inlined_call_operand.vmem [shape: f32[64,4], index: 1, kind: input, shape index: {}]   ;;  %s900_s2 = inlined_call_operand.vmem [shape: f32[1,4], index: 2, kind: input, shape index: {}]   ;;  %s901_s3 = inlined_call_operand.vmem [shape: f32[4,64], index: 3, kind: input, shape index: {}]   ;;  %s902_s4 = inlined_call_operand.vmem [shape: f32[1,64], index: 4, kind: input, shape index: {}]   ;;  %s903_s5 = inlined_call_operand.vmem [shape: f32[2,64,256], index: 5, kind: output, shape index: {}]  }
   0x1 LB: > { %s627_s19 = sadd.s32 4294967295, %s712_s18   ;;  %p631_p0 = scmp.ge.s32.totalorder %s712_s18, 1  ;;  %s712_s18 = sphi %s747_s18, %s15_s18  }
   0x2   : > { %p187_p1 = scmp.lt.s32.totalorder %s712_s18, 3 }
   0x4   : > { %p188_p2 = pnand %p631_p0, %p187_p1 }
   0x5   : > { %p215_p3 = scmp.lt.s32.totalorder (!%p188_p2), %s627_s19, 1  ;;  %v273_v24 = vld [vmem:[%s899_s1] sm:$0xff] (!%p188_p2)  ;;  %v274_v25 = vld [vmem:[%s899_s1 + $0x8] sm:$0xff] (!%p188_p2)  ;;  %v714_v27 = vmov (!%p188_p2), 0.0|0.0   ;;  %v275_v28 = vld [vmem:[%s899_s1 + $0x10] sm:$0xff] (!%p188_p2)  ;;  %vm715_vm0 = vmmov (!%p188_p2), 0   ;;  %v290_v38 = vlaneseq (!%p188_p2) }
   0x6   : > { %191 = sbr.rel (%p188_p2) target bundleno = 771 (0x303), region = 40  ;;  %v680_v26 = vpack.c.bf16 (!%p188_p2), %v274_v25, %v273_v24  ;;  %679 = vmatprep.subr.bf16.mxu0 (!%p188_p2), %v714_v27  ;;  %v276_v29 = vld [vmem:[%s899_s1 + $0x18] sm:$0xff] (!%p188_p2)  ;;  %v277_v31 = vld [vmem:[%s899_s1 + $0x20] sm:$0xff] (!%p188_p2)  ;;  %v278_v32 = vld [vmem:[%s899_s1 + $0x28] sm:$0xff] (!%p188_p2)  ;;  %v716_v37 = vmov (!%p188_p2), 0.0   ;;  %vm301_vm1 = vcmask (!%p188_p2), 130112  }
   0x7   : > { %v683_v30 = vpack.c.bf16 (!%p188_p2), %v276_v29, %v275_v28  ;;  %v686_v33 = vpack.c.bf16 (!%p188_p2), %v278_v32, %v277_v31  ;;  %v279_v34 = vld [vmem:[%s899_s1 + $0x30] sm:$0xff] (!%p188_p2)  ;;  %v280_v35 = vld [vmem:[%s899_s1 + $0x38] sm:$0xff] (!%p188_p2)  ;;  %671 = vmatprep.mubr.msk.f32.mxu0 (!%p188_p2), %vm715_vm0, %v716_v37  ;;  %674 = vmatprep.subr.mxu1 (!%p188_p2), %v716_v37  ;;  %v291_v39 = vand.u32 (!%p188_p2), 127, %v290_v38  ;;  %v835_v40 = vshrl.u32 (!%p188_p2), %v290_v38, 7 }
   0x8   : > { %681 = vmatpush3.bf16.msra.mxu0 (!%p188_p2), %v680_v26  ;;  %v689_v36 = vpack.c.bf16 (!%p188_p2), %v280_v35, %v279_v34  ;;  %676 = vmatprep.mubr.msk.f32.mxu1 (!%p188_p2), %vm715_vm0, %v716_v37  ;;  %vm308_vm2 = vcmask (!%p188_p2), 195712   ;;  %vm315_vm3 = vcmask (!%p188_p2), 261312   ;;  %vm322_vm4 = vcmask (!%p188_p2), 326912  }
   0x9   : > { %682 = vmatprep.subr.bf16.mxu0 (!%p188_p2), %v714_v27  ;;  %v296_v41 = vadd.s32 (!%p188_p2), 4294967288, %v291_v39  ;;  %v303_v43 = vadd.s32 (!%p188_p2), 4294967280, %v291_v39  ;;  %v310_v44 = vadd.s32 (!%p188_p2), 4294967272, %v291_v39  ;;  %v294_v46 = vsub.s32 (!%p188_p2), %v291_v39, %v835_v40 }
   0xa   : > { %v317_v49 = vadd.s32 (!%p188_p2), 4294967264, %v291_v39  ;;  %v324_v54 = vadd.s32 (!%p188_p2), 4294967256, %v291_v39  ;;  %v331_v61 = vadd.s32 (!%p188_p2), 4294967248, %v291_v39  ;;  %vm329_vm5 = vcmask (!%p188_p2), 392512  }
   0xb   : > { %v299_v48 = vsub.s32 (!%p188_p2), %v296_v41, %v835_v40  ;;  %v306_v50 = vsub.s32 (!%p188_p2), %v303_v43, %v835_v40  ;;  %v313_v53 = vsub.s32 (!%p188_p2), %v310_v44, %v835_v40  ;;  %vm336_vm6 = vcmask (!%p188_p2), 458112   ;;  %v281_v41 = vld [vmem:[%s900_s2] sm:$0x1] (!%p188_p2) }
   0xc   : > { %684 = vmatpush3.bf16.msra.mxu0 (!%p188_p2), %v683_v30  ;;  %v320_v60 = vsub.s32 (!%p188_p2), %v317_v49, %v835_v40  ;;  %v334_v26 = vsub.s32 (!%p188_p2), %v331_v61, %v835_v40  ;;  %vm343_vm7 = vcmask (!%p188_p2), 523712   ;;  %vm345_vm8 = vcmask (!%p188_p2), 523264  }
   0xd   : > { %s905_s19 = smov (!%p215_p3, %s627_s19), 1  ;;  %685 = vmatprep.subr.bf16.mxu0 %v714_v27  ;;  %vm425_vm9 = vcmask 1043456   ;;  %vm421_vm10 = vcmask 31744  }
   0xe   : > { %s642_s20 = sshll.u32 %s905_s19, 7 }
   0xf   : > { %s219_s23 = scalar_lea.vmem %s898_s0, %s642_s20  ;;  %s861_s26 = scalar_lea.vmem %s903_s5, %s642_s20 }
  0x10   : > { %v763_v0 = vld [vmem:[%s219_s23] sm:$0xff]  ;;  %v765_v1 = vld [vmem:[%s219_s23 + $0x8] sm:$0xff]  ;;  %v773_v5 = vld [vmem:[%s219_s23 + $0x10] sm:$0xff]  ;;  %687 = vmatpush3.bf16.msra.mxu0 %v686_v33 }
  0x11   : > { %v767_v2 = vld [vmem:[%s219_s23 + $0x20] sm:$0xff]  ;;  %v241_v3 = vadd.f32 %v765_v1, %v763_v0  ;;  %v771_v4 = vld [vmem:[%s219_s23 + $0x28] sm:$0xff]  ;;  %v775_v6 = vld [vmem:[%s219_s23 + $0x18] sm:$0xff]  ;;  %688 = vmatprep.subr.bf16.mxu0 %v714_v27 }
  0x12   : > { %v247_v7 = vadd.f32 %v771_v4, %v767_v2  ;;  %v779_v8 = vld [vmem:[%s219_s23 + $0x30] sm:$0xff]  ;;  %v781_v9 = vld [vmem:[%s219_s23 + $0x38] sm:$0xff]  ;;  %v244_v10 = vadd.f32 %v775_v6, %v773_v5  ;;  %v787_v12 = vld [vmem:[%s219_s23 + $0x40] sm:$0xff] }
  0x13   : > { %242 = vadd.xlane.f32.xlu0 %v241_v3  ;;  %v250_v11 = vadd.f32 %v781_v9, %v779_v8  ;;  %v789_v13 = vld [vmem:[%s219_s23 + $0x48] sm:$0xff]  ;;  %v791_v14 = vld [vmem:[%s219_s23 + $0x50] sm:$0xff]  ;;  %v793_v15 = vld [vmem:[%s219_s23 + $0x58] sm:$0xff] }
  0x14   : > { %248 = vadd.xlane.f32.xlu1 %v247_v7  ;;  %v253_v16 = vadd.f32 %v789_v13, %v787_v12  ;;  %v256_v17 = vadd.f32 %v793_v15, %v791_v14  ;;  %v799_v18 = vld [vmem:[%s219_s23 + $0x60] sm:$0xff]  ;;  %v801_v19 = vld [vmem:[%s219_s23 + $0x68] sm:$0xff]  ;;  %v803_v20 = vld [vmem:[%s219_s23 + $0x70] sm:$0xff]  ;;  %690 = vmatpush3.bf16.msra.mxu0 %v689_v36  ;;  %v327_v7 = vsub.s32 %v324_v54, %v835_v40 }
  0x15   : > { %v805_v21 = vld [vmem:[%s219_s23 + $0x78] sm:$0xff]  ;;  %v259_v22 = vadd.f32 %v801_v19, %v799_v18 }
  0x16   : > { %v262_v23 = vadd.f32 %v805_v21, %v803_v20 }
  0x17   : > { %245 = vadd.xlane.f32.xlu0 %v244_v10  ;;  %v338_v10 = vadd.s32 4294967240, %v291_v39  ;;  %v419_v39 = vld [vmem:[%s901_s3] sm:$0xf] }
  0x18   : > { %251 = vadd.xlane.f32.xlu1 %v250_v11  ;;  %675 = vmatpush3.msk.msra.mxu1 %vm425_vm9, %v419_v39 }
  0x19   : > { %v341_v29 = vsub.s32 %v338_v10, %v835_v40 }
  0x1b   : > { %254 = vadd.xlane.f32.xlu0 %v253_v16 }
  0x1c   : > { %257 = vadd.xlane.f32.xlu1 %v256_v17 }
  0x1f   : > { %260 = vadd.xlane.f32.xlu0 %v259_v22 }
  0x20   : > { %263 = vadd.xlane.f32.xlu1 %v262_v23 }
  0xa0   : > { %v243_v42 = vpop.xlane.xlu0 %242 }
  0xa1   : > { %v249_v45 = vpop.xlane.xlu1 %248  ;;  %v265_v47 = vmul.f32 0.00390625, %v243_v42 }
  0xa2   : > { %v267_v51 = vmul.f32 0.00390625, %v249_v45 }
  0xa3   : > { %v295_v58 = vrot.slane %v265_v47, %v294_v46  ;;  %v420_v46 = vld [vmem:[%s902_s4] sm:$0x1] }
  0xa4   : > { %v246_v52 = vpop.xlane.xlu0 %245  ;;  %v307_v62 = vrot.slane %v267_v51, %v306_v50 }
  0xa5   : > { %v266_v55 = vmul.f32 0.00390625, %v246_v52  ;;  %v252_v56 = vpop.xlane.xlu1 %251 }
  0xa6   : > { %v268_v57 = vmul.f32 0.00390625, %v252_v56 }
  0xa7   : > { %v300_v59 = vrot.slane %v266_v55, %v299_v48 }
  0xa8   : > { %v314_v63 = vrot.slane %v268_v57, %v313_v53  ;;  %v255_v3 = vpop.xlane.xlu0 %254  ;;  %v507_v53 = vsub.s32 0, %v835_v40 }
  0xa9   : > { %v302_v11 = vsel %vm301_vm1, %v300_v59, %v295_v58  ;;  %v269_v16 = vmul.f32 0.00390625, %v255_v3  ;;  %v258_v17 = vpop.xlane.xlu1 %257 }
  0xaa   : > { %v309_v22 = vsel %vm308_vm2, %v307_v62, %v302_v11  ;;  %v270_v23 = vmul.f32 0.00390625, %v258_v17 }
  0xab   : > { %v316_v24 = vsel %vm315_vm3, %v314_v63, %v309_v22  ;;  %v321_v25 = vrot.slane %v269_v16, %v320_v60 }
  0xac   : > { %v328_v27 = vrot.slane %v270_v23, %v327_v7  ;;  %v261_v28 = vpop.xlane.xlu0 %260 }
  0xad   : > { %v323_v30 = vsel %vm322_vm4, %v321_v25, %v316_v24  ;;  %v271_v31 = vmul.f32 0.00390625, %v261_v28  ;;  %v264_v32 = vpop.xlane.xlu1 %263 }
  0xae   : > { %v272_v33 = vmul.f32 0.00390625, %v264_v32  ;;  %v330_v35 = vsel %vm329_vm5, %v328_v27, %v323_v30 }
  0xaf   : > { %v335_v34 = vrot.slane %v271_v31, %v334_v26 }
  0xb0   : > { %v342_v36 = vrot.slane %v272_v33, %v341_v29 }
  0xb1   : > { %v337_v37 = vsel %vm336_vm6, %v335_v34, %v330_v35 }
  0xb2   : > { %v344_v38 = vsel %vm343_vm7, %v342_v36, %v337_v37 }
  0xb3   : > { %672 = vmatmul.mubr.msk.f32.vlgmr.msra.gmra.mrb[0].mxu0 %vm345_vm8, %v344_v38 }
 0x186   : > { %v414_v42 = vpop.f32.mrb[0].mxu0 }
 0x187   : > { %v415_v43 = vadd.f32 %v414_v42, %v281_v41  ;;  %v673_v44 = vpop.f32.mrb[1].mxu0 }
 0x189   : > { %v418_v45 = vmax.f32 %v415_v43, 0.0 }
 0x18b   : > { %677 = vmatmul.mubr.msk.f32.vlgmr.msra.gmra.mrb[0].mxu1 %vm421_vm10, %v418_v45 }
 0x25e   : > { %v495_v47 = vpop.f32.mrb[0].mxu1 }
 0x25f   : > { %v496_v48 = vadd.f32 %v495_v47, %v420_v46  ;;  %v678_v49 = vpop.f32.mrb[1].mxu1 }
 0x261   : > { %v639_v50 = vmul.f32 -1.442695, %v496_v48 }
 0x263   : > { %702 = vpow2.f32 %v639_v50 }
 0x26d   : > { %v703_v51 = vpop.eup %702 }
 0x26e   : > { %v502_v52 = vadd.f32 1.0, %v703_v51 }
 0x270   : > { %704 = vrcp.f32 %v502_v52 }
 0x27a   : > { %v705_v54 = vpop.eup %704 }
 0x27b   : > { %v508_v55 = vrot.slane %v705_v54, %v507_v53 }
 0x27d   : > { %514 = vbcast.lane.b32.xlu1 %v508_v55, 264  ;;  %510 = vbcast.lane.b32.xlu0 %v508_v55, 256 }
 0x281   : > { %518 = vbcast.lane.b32.xlu1 %v508_v55, 272  ;;  %526 = vbcast.lane.b32.xlu0 %v508_v55, 288 }
 0x285   : > { %522 = vbcast.lane.b32.xlu1 %v508_v55, 280  ;;  %534 = vbcast.lane.b32.xlu0 %v508_v55, 304 }
 0x289   : > { %530 = vbcast.lane.b32.xlu1 %v508_v55, 296 }
 0x28d   : > { %538 = vbcast.lane.b32.xlu1 %v508_v55, 312 }
 0x2ef   : > { %v515_v40 = vpop.permute.xlu1 %514  ;;  %v511_v56 = vpop.permute.xlu0 %510 }
 0x2f0   : > { %v542_v57 = vmul.f32 %v515_v40, %v773_v5  ;;  %v543_v58 = vmul.f32 %v515_v40, %v775_v6  ;;  %v540_v59 = vmul.f32 %v511_v56, %v763_v0  ;;  %v541_v60 = vmul.f32 %v511_v56, %v765_v1 }
 0x2f2   : > { %558 = vst [vmem:[%s861_s26 + $0x10] sm:$0xff] %v542_v57  ;;  %559 = vst [vmem:[%s861_s26 + $0x18] sm:$0xff] %v543_v58 }
 0x2f3   : > { %556 = vst [vmem:[%s861_s26] sm:$0xff] %v540_v59  ;;  %557 = vst [vmem:[%s861_s26 + $0x8] sm:$0xff] %v541_v60  ;;  %v519_v61 = vpop.permute.xlu1 %518  ;;  %v527_v62 = vpop.permute.xlu0 %526 }
 0x2f4   : > { %v544_v63 = vmul.f32 %v519_v61, %v767_v2  ;;  %v545_v5 = vmul.f32 %v519_v61, %v771_v4  ;;  %v548_v6 = vmul.f32 %v527_v62, %v787_v12  ;;  %v549_v0 = vmul.f32 %v527_v62, %v789_v13 }
 0x2f6   : > { %560 = vst [vmem:[%s861_s26 + $0x20] sm:$0xff] %v544_v63  ;;  %561 = vst [vmem:[%s861_s26 + $0x28] sm:$0xff] %v545_v5 }
 0x2f7   : > { %564 = vst [vmem:[%s861_s26 + $0x40] sm:$0xff] %v548_v6  ;;  %565 = vst [vmem:[%s861_s26 + $0x48] sm:$0xff] %v549_v0  ;;  %v523_v1 = vpop.permute.xlu1 %522  ;;  %v535_v3 = vpop.permute.xlu0 %534 }
 0x2f8   : > { %v546_v7 = vmul.f32 %v523_v1, %v779_v8  ;;  %v547_v2 = vmul.f32 %v523_v1, %v781_v9  ;;  %v552_v4 = vmul.f32 %v535_v3, %v799_v18  ;;  %v553_v12 = vmul.f32 %v535_v3, %v801_v19 }
 0x2fa   : > { %562 = vst [vmem:[%s861_s26 + $0x30] sm:$0xff] %v546_v7  ;;  %563 = vst [vmem:[%s861_s26 + $0x38] sm:$0xff] %v547_v2 }
 0x2fb   : > { %568 = vst [vmem:[%s861_s26 + $0x60] sm:$0xff] %v552_v4  ;;  %569 = vst [vmem:[%s861_s26 + $0x68] sm:$0xff] %v553_v12  ;;  %v531_v13 = vpop.permute.xlu1 %530 }
 0x2fc   : > { %v550_v10 = vmul.f32 %v531_v13, %v791_v14  ;;  %v551_v11 = vmul.f32 %v531_v13, %v793_v15 }
 0x2fe   : > { %566 = vst [vmem:[%s861_s26 + $0x50] sm:$0xff] %v550_v10  ;;  %567 = vst [vmem:[%s861_s26 + $0x58] sm:$0xff] %v551_v11 }
 0x2ff   : > { %v539_v8 = vpop.permute.xlu1 %538 }
 0x300   : > { %v554_v16 = vmul.f32 %v539_v8, %v803_v20  ;;  %v555_v9 = vmul.f32 %v539_v8, %v805_v21 }
 0x302   : > { %570 = vst [vmem:[%s861_s26 + $0x70] sm:$0xff] %v554_v16  ;;  %571 = vst [vmem:[%s861_s26 + $0x78] sm:$0xff] %v555_v9 }
 0x303 PF: > { %s15_s18 = sadd.s32 1, %s712_s18  }
 0x304   : > { %p12_p4 = scmp.ge.s32.totalorder %s15_s18, 4  }
 0x306   :  { %14 = sbr.rel (!%p12_p4) target bundleno = 1 (0x1), region = 70 }

</bundles_post_ra>
